<compile_context>
chip_gen: v6e
topology: v6e:2x2x1
jax: 0.10.0
libtpu: 0.0.40
codegen_flags: <defaults>
</compile_context>

<pallas_src>
import functools
import numpy as np
import jax
import jax.numpy as jnp
from jax.experimental import pallas as pl
from jax.experimental.pallas import tpu as pltpu

LN_EPS = 1e-5                 # torch.nn.LayerNorm default
_SQRT1_2 = 0.7071067811865476


# ----------------------------- in-kernel helpers -----------------------------

def _layernorm(x, w, b):
    mu = jnp.mean(x, axis=-1, keepdims=True)
    var = jnp.mean((x - mu) ** 2, axis=-1, keepdims=True)
    return (x - mu) * jax.lax.rsqrt(var + LN_EPS) * w + b


def _vmem_limit_bytes():
    # <= 3/4 of physical VMEM per core, capped at 64 MiB (so v7x -> 48 MiB,
    # v5e/v6e -> 64 MiB).  Falls back safely if the query is unavailable.
    cap = 128 * 1024 * 1024
    try:
        info = pltpu.get_tpu_info()
        cap = int(getattr(info, "vmem_capacity_bytes", None) or cap)
    except Exception:
        pass
    return int(min(64 * 1024 * 1024, (cap * 3) // 4))


# ----------------------------- Pallas kernels -----------------------------

def patch_embed_kernel(p_ref, w_ref, b_ref, pos_ref, o_ref):
    # p_ref: (1, tm, K) bf16   w_ref: (K, E) bf16   b_ref: (1, E) f32
    # pos_ref: (1, tm, E) f32  o_ref: (1, tm, E) bf16
    o_ref[0] = (
        jnp.dot(p_ref[0], w_ref[...], preferred_element_type=jnp.float32)
        + b_ref[...]
        + pos_ref[0]
    ).astype(o_ref.dtype)


def encoder_kernel(x_ref, ln1w_ref, ln1b_ref, wqkv_ref, wproj_ref, bproj_ref,
                   ln2w_ref, ln2b_ref, w1_ref, b1_ref, w2_ref, b2_ref,
                   fw_ref, fb_ref, o_ref, res_ref, *, num_heads, head_dim):
    """One (batch-row, layer) grid step of the fused transformer encoder.

    grid = (B, depth); the f32 residual stream is carried across the depth axis
    in `res_ref` (VMEM scratch), initialized from x_ref at layer 0 and
    LayerNorm'ed into o_ref on the last layer.
    """
    l = pl.program_id(1)
    H, D = num_heads, head_dim
    N, C = res_ref.shape

    @pl.when(l == 0)
    def _():
        res_ref[...] = x_ref[0].astype(jnp.float32)

    x = res_ref[...]                                            # (N, C) f32 residual

    # ---- pre-LN attention (qkv_bias=False, gamma_1 None, 1/sqrt(D) folded in Wq) ----
    h1 = _layernorm(x, ln1w_ref[0], ln1b_ref[0]).astype(jnp.bfloat16)         # (N, C)
    # One full-width QKV matmul: K=C contraction, 3C-wide output.
    qkv = jnp.dot(h1, wqkv_ref[0], preferred_element_type=jnp.float32)        # (N, 3C)

    # Split heads off the lane axis (columns ordered (which, head, head_dim)).
    def _heads(base):
        return jnp.stack(
            [qkv[:, (base + h) * D:(base + h + 1) * D] for h in range(H)], axis=0)

    q = _heads(0).astype(jnp.bfloat16)                                        # (H, N, D)
    k = _heads(H).astype(jnp.bfloat16)
    v = _heads(2 * H).astype(jnp.bfloat16)

    s = jnp.einsum('hqd,hkd->hqk', q, k, preferred_element_type=jnp.float32)  # (H, N, N)
    s = s - jnp.max(s, axis=-1, keepdims=True)
    p = jnp.exp(s)
    p = p * pl.reciprocal(jnp.sum(p, axis=-1, keepdims=True), approx=True)

    ao = jnp.einsum('hqk,hkd->hqd', p.astype(jnp.bfloat16), v,
                    preferred_element_type=jnp.float32)                        # (H, N, D)
    # Concat heads back to (N, C) and do ONE K=C output projection.
    ao = jnp.concatenate([ao[h] for h in range(H)], axis=-1).astype(jnp.bfloat16)
    x = x + jnp.dot(ao, wproj_ref[0], preferred_element_type=jnp.float32) + bproj_ref[0]

    # ---- pre-LN MLP (exact erf GELU) ----
    h2 = _layernorm(x, ln2w_ref[0], ln2b_ref[0]).astype(jnp.bfloat16)
    z = jnp.dot(h2, w1_ref[0], preferred_element_type=jnp.float32) + b1_ref[0]
    z = 0.5 * z * (1.0 + jax.lax.erf(z * _SQRT1_2))
    z = jnp.dot(z.astype(jnp.bfloat16), w2_ref[0],
                preferred_element_type=jnp.float32) + b2_ref[0]
    x = x + z

    res_ref[...] = x
    o_ref[0] = x                      # cheap insurance; overwritten below on last step

    @pl.when(l == pl.num_programs(1) - 1)
    def _():
        o_ref[0] = _layernorm(x, fw_ref[...], fb_ref[...])   # fused final encoder LN


def norm_kernel(x_ref, w_ref, b_ref, o_ref):
    # only used when depth == 0
    o_ref[0] = _layernorm(x_ref[0].astype(jnp.float32), w_ref[...], b_ref[...])


# ----------------------------- wrappers -----------------------------

def _row_tile(n, target=512):
    """Largest divisor of n that is <= target and a multiple of 8 (or n itself)."""
    for t in range(min(n, target), 0, -1):
        if n % t == 0 and (t % 8 == 0 or t == n):
            return t
    return n


def pallas_patch_embed(patches, w, b, pos):
    # patches: (B, Nvis, K) bf16   w: (K, E) bf16   b: (1, E) f32   pos: (B, Nvis, E) f32
    B, NV, K = patches.shape
    E = w.shape[1]
    tm = _row_tile(NV)
    grid = (B, NV // tm)
    return pl.pallas_call(
        patch_embed_kernel,
        out_shape=jax.ShapeDtypeStruct((B, NV, E), jnp.bfloat16),
        grid=grid,
        in_specs=[
            pl.BlockSpec((1, tm, K), lambda bi, ni: (bi, ni, 0)),
            pl.BlockSpec((K, E), lambda bi, ni: (0, 0)),
            pl.BlockSpec((1, E), lambda bi, ni: (0, 0)),
            pl.BlockSpec((1, tm, E), lambda bi, ni: (bi, ni, 0)),
        ],
        out_specs=pl.BlockSpec((1, tm, E), lambda bi, ni: (bi, ni, 0)),
        compiler_params=pltpu.CompilerParams(
            dimension_semantics=("parallel", "parallel"),
            vmem_limit_bytes=_vmem_limit_bytes()),
    )(patches, w, b, pos)


def pallas_encoder(x_vis, layers, final_w, final_b, num_heads):
    """All transformer blocks + final LayerNorm in one fused pallas_call."""
    B, N, C = x_vis.shape
    depth = layers["wqkv"].shape[0]
    hidden = layers["w1"].shape[2]
    H = num_heads
    D = C // H
    kernel = functools.partial(encoder_kernel, num_heads=H, head_dim=D)

    def per_layer(r, c):
        # stacked per-layer parameter, block indexed by the depth grid axis
        return pl.BlockSpec((1, r, c), lambda b, l: (l, 0, 0))

    in_specs = [
        pl.BlockSpec((1, N, C), lambda b, l: (b, 0, 0)),     # x_vis (read at l==0)
        per_layer(1, C), per_layer(1, C),                    # ln1 w, b
        per_layer(C, 3 * C),                                 # wqkv (C, 3C)
        per_layer(C, C),                                     # wproj (C, C)
        per_layer(1, C),                                     # bproj
        per_layer(1, C), per_layer(1, C),                    # ln2 w, b
        per_layer(C, hidden), per_layer(1, hidden),          # fc1
        per_layer(hidden, C), per_layer(1, C),               # fc2
        pl.BlockSpec((1, C), lambda b, l: (0, 0)),           # final norm w
        pl.BlockSpec((1, C), lambda b, l: (0, 0)),           # final norm b
    ]
    args = [x_vis,
            layers["ln1_w"], layers["ln1_b"],
            layers["wqkv"], layers["wproj"], layers["bproj"],
            layers["ln2_w"], layers["ln2_b"],
            layers["w1"], layers["b1"], layers["w2"], layers["b2"],
            final_w, final_b]

    return pl.pallas_call(
        kernel,
        out_shape=jax.ShapeDtypeStruct((B, N, C), jnp.float32),
        grid=(B, depth),
        in_specs=in_specs,
        out_specs=pl.BlockSpec((1, N, C), lambda b, l: (b, 0, 0)),
        scratch_shapes=[pltpu.VMEM((N, C), jnp.float32)],     # residual, carried over depth
        compiler_params=pltpu.CompilerParams(
            dimension_semantics=("parallel", "arbitrary"),
            vmem_limit_bytes=_vmem_limit_bytes()),
    )(*args)


def pallas_layernorm(x, w, b):
    # only used when depth == 0
    B, N, C = x.shape
    return pl.pallas_call(
        norm_kernel,
        out_shape=jax.ShapeDtypeStruct((B, N, C), jnp.float32),
        grid=(B,),
        in_specs=[pl.BlockSpec((1, N, C), lambda i: (i, 0, 0)),
                  pl.BlockSpec((1, C), lambda i: (0, 0)),
                  pl.BlockSpec((1, C), lambda i: (0, 0))],
        out_specs=pl.BlockSpec((1, N, C), lambda i: (i, 0, 0)),
        compiler_params=pltpu.CompilerParams(dimension_semantics=("parallel",)),
    )(x, w, b)


# ----------------------------- glue -----------------------------

def get_sinusoid_encoding_table(n_position, d_hid):
    pos = np.arange(n_position)[:, None].astype(np.float64)
    j = np.arange(d_hid)[None, :]
    angle = pos / np.power(10000.0, 2.0 * (j // 2) / d_hid)
    table = np.zeros((n_position, d_hid), dtype=np.float64)
    table[:, 0::2] = np.sin(angle[:, 0::2])
    table[:, 1::2] = np.cos(angle[:, 1::2])
    return jnp.asarray(table, dtype=jnp.float32)          # (n_position, d_hid)


def patchify(x, tubelet, ph, pw):
    # Conv3d(kernel == stride) input unfolding; K ordered (c, kt, kh, kw).
    B, C, T, H, W = x.shape
    x = x.reshape(B, C, T // tubelet, tubelet, H // ph, ph, W // pw, pw)
    x = x.transpose(0, 2, 4, 6, 1, 3, 5, 7)   # (B, T', H', W', C, tub, ph, pw)
    return x.reshape(B, (T // tubelet) * (H // ph) * (W // pw), C * tubelet * ph * pw)


def init_params(key, patch_dim, embed_dim, depth, mlp_ratio, num_patches, num_heads):
    hidden = int(embed_dim * mlp_ratio)
    C = embed_dim
    H = num_heads
    D = C // H
    scale = float(D) ** (-0.5)
    keys = jax.random.split(key, 1 + 4 * max(depth, 1))

    def w(k, shape):
        return jax.random.normal(k, shape, dtype=jnp.float32) * 0.02

    params = {
        "patch_w": w(keys[0], (patch_dim, C)).astype(jnp.bfloat16),   # Conv3d W^T
        "patch_b": jnp.zeros((1, C), jnp.float32),
        "pos_embed": get_sinusoid_encoding_table(num_patches, C),
        "norm_w": jnp.ones((1, C), jnp.float32),
        "norm_b": jnp.zeros((1, C), jnp.float32),
        "layers": None,
    }
    if depth == 0:
        return params

    # Fold the 1/sqrt(head_dim) attention scale into the Q columns of the (C, 3C)
    # QKV weight (columns ordered (which, head, head_dim), exactly torch's layout).
    qcol_scale = jnp.concatenate([jnp.full((C,), scale, jnp.float32),
                                  jnp.ones((2 * C,), jnp.float32)])[None, :]

    ln1_w, ln1_b, wqkv_l, wproj_l, bproj_l = [], [], [], [], []
    ln2_w, ln2_b, w1_l, b1_l, w2_l, b2_l = [], [], [], [], [], []
    ki = 1
    for _ in range(depth):
        ln1_w.append(jnp.ones((1, C), jnp.float32))
        ln1_b.append(jnp.zeros((1, C), jnp.float32))
        wqkv_l.append((w(keys[ki], (C, 3 * C)) * qcol_scale).astype(jnp.bfloat16))
        wproj_l.append(w(keys[ki + 1], (C, C)).astype(jnp.bfloat16))
        bproj_l.append(jnp.zeros((1, C), jnp.float32))
        ln2_w.append(jnp.ones((1, C), jnp.float32))
        ln2_b.append(jnp.zeros((1, C), jnp.float32))
        w1_l.append(w(keys[ki + 2], (C, hidden)).astype(jnp.bfloat16))
        b1_l.append(jnp.zeros((1, hidden), jnp.float32))
        w2_l.append(w(keys[ki + 3], (hidden, C)).astype(jnp.bfloat16))
        b2_l.append(jnp.zeros((1, C), jnp.float32))
        ki += 4

    params["layers"] = {
        "ln1_w": jnp.stack(ln1_w), "ln1_b": jnp.stack(ln1_b),          # (depth, 1, C)
        "wqkv": jnp.stack(wqkv_l),                                     # (depth, C, 3C)
        "wproj": jnp.stack(wproj_l),                                   # (depth, C, C)
        "bproj": jnp.stack(bproj_l),
        "ln2_w": jnp.stack(ln2_w), "ln2_b": jnp.stack(ln2_b),
        "w1": jnp.stack(w1_l), "b1": jnp.stack(b1_l),
        "w2": jnp.stack(w2_l), "b2": jnp.stack(b2_l),
    }
    return params


def encoder_forward(x, vis_idx, params, *, patch_size, tubelet, num_heads):
    # Patchify in XLA (pure reshape/transpose), then gather ONLY the visible
    # patches and their positional rows, so masked patches are never embedded and
    # the full (B, NP, E) token tensor never touches HBM.
    patches = patchify(x, tubelet, patch_size, patch_size)                     # (B, NP, K)
    patches_vis = jnp.take_along_axis(
        patches, vis_idx[:, :, None], axis=1).astype(jnp.bfloat16)             # (B, Nvis, K)
    pos_vis = params["pos_embed"][vis_idx]                                     # (B, Nvis, E)

    x_vis = pallas_patch_embed(patches_vis, params["patch_w"],
                               params["patch_b"], pos_vis)                     # (B, Nvis, E) bf16

    if params["layers"] is None:
        return pallas_layernorm(x_vis, params["norm_w"], params["norm_b"])

    # head = nn.Identity() since num_classes == 0
    return pallas_encoder(x_vis, params["layers"],
                          params["norm_w"], params["norm_b"], num_heads)


# ----------------------------- main -----------------------------

if __name__ == "__main__":
    # Small configuration consistent with the module
    B, Cin, T, H, W = 2, 3, 4, 16, 16
    patch_size = 8
    tubelet = 2
    embed_dim = 64
    depth = 2
    num_heads = 4
    mlp_ratio = 4.0
    num_patches = (T // tubelet) * (H // patch_size) * (W // patch_size)   # 8
    patch_dim = Cin * tubelet * patch_size * patch_size                    # 384

    key = jax.random.PRNGKey(0)
    kx, kp = jax.random.split(key)
    x = jax.random.normal(kx, (B, Cin, T, H, W), dtype=jnp.float32)

    # boolean mask (True = masked out), fixed number of visible tokens per row
    rng = np.random.RandomState(0)
    mask_np = np.zeros((B, num_patches), dtype=bool)
    n_masked = num_patches // 2
    for b in range(B):
        mask_np[b, rng.permutation(num_patches)[:n_masked]] = True
    vis_idx = jnp.asarray(
        np.stack([np.nonzero(~mask_np[b])[0] for b in range(B)]), dtype=jnp.int32)

    params = init_params(kp, patch_dim, embed_dim, depth, mlp_ratio,
                         num_patches, num_heads)

    out = encoder_forward(x, vis_idx, params,
                          patch_size=patch_size, tubelet=tubelet, num_heads=num_heads)
    jax.block_until_ready(out)
    assert out.shape == (B, num_patches - n_masked, embed_dim)
    assert out.dtype == jnp.float32
    print("KERNEL_OK")
</pallas_src>

<mosaic_0001>
module attributes {stable_mosaic.version = 11 : i64} {
  func.func @patch_embed_kernel(%arg0: i32, %arg1: i32, %arg2: memref<1x4x384xbf16, #tpu.memory_space<vmem>>, %arg3: memref<384x64xbf16, #tpu.memory_space<vmem>>, %arg4: memref<1x64xf32, #tpu.memory_space<vmem>>, %arg5: memref<1x4x64xf32, #tpu.memory_space<vmem>>, %arg6: memref<1x4x64xbf16, #tpu.memory_space<vmem>>) attributes {dimension_semantics = [#tpu.dimension_semantics<parallel>, #tpu.dimension_semantics<parallel>], iteration_bounds = array<i64: 2, 1>, scalar_prefetch = 0 : i64, scratch_operands = 0 : i64, tpu.core_type = #tpu.core_type<tc>, window_params = [{transform_indices = @transform_0, window_bounds = array<i64: 1, 4, 384>}, {pipeline_mode = #tpu.pipeline_mode<synchronous>, transform_indices = @transform_1, window_bounds = array<i64: 384, 64>}, {pipeline_mode = #tpu.pipeline_mode<synchronous>, transform_indices = @transform_2, window_bounds = array<i64: 1, 64>}, {transform_indices = @transform_3, window_bounds = array<i64: 1, 4, 64>}, {transform_indices = @transform_4, window_bounds = array<i64: 1, 4, 64>}]} {
    %c0 = arith.constant 0 : index
    %c0_0 = arith.constant 0 : index
    %c0_1 = arith.constant 0 : index
    %0 = vector.load %arg2[%c0, %c0_0, %c0_1] : memref<1x4x384xbf16, #tpu.memory_space<vmem>>, vector<1x4x384xbf16>
    %1 = vector.shape_cast %0 : vector<1x4x384xbf16> to vector<4x384xbf16>
    %c0_2 = arith.constant 0 : index
    %c0_3 = arith.constant 0 : index
    %2 = vector.load %arg3[%c0_2, %c0_3] : memref<384x64xbf16, #tpu.memory_space<vmem>>, vector<384x64xbf16>
    %cst = arith.constant dense<0.000000e+00> : vector<4x64xf32>
    %3 = tpu.matmul %1, %2, %cst {dimension_numbers = #tpu.dot_dimension_numbers<[1], [0], [0], [1], [0, 0, 1, 1], [], []>} : vector<4x384xbf16>, vector<384x64xbf16>, vector<4x64xf32> -> vector<4x64xf32>
    %c0_4 = arith.constant 0 : index
    %c0_5 = arith.constant 0 : index
    %4 = vector.load %arg4[%c0_4, %c0_5] : memref<1x64xf32, #tpu.memory_space<vmem>>, vector<1x64xf32>
    %5 = vector.broadcast %4 : vector<1x64xf32> to vector<4x64xf32>
    %6 = arith.addf %3, %5 : vector<4x64xf32>
    %c0_6 = arith.constant 0 : index
    %c0_7 = arith.constant 0 : index
    %c0_8 = arith.constant 0 : index
    %7 = vector.load %arg5[%c0_6, %c0_7, %c0_8] : memref<1x4x64xf32, #tpu.memory_space<vmem>>, vector<1x4x64xf32>
    %8 = vector.shape_cast %7 : vector<1x4x64xf32> to vector<4x64xf32>
    %9 = arith.addf %6, %8 : vector<4x64xf32>
    %10 = arith.truncf %9 : vector<4x64xf32> to vector<4x64xbf16>
    %c0_9 = arith.constant 0 : index
    %c0_10 = arith.constant 0 : index
    %c0_11 = arith.constant 0 : index
    %11 = vector.load %arg6[%c0_9, %c0_10, %c0_11] : memref<1x4x64xbf16, #tpu.memory_space<vmem>>, vector<1x4x64xbf16>
    %12 = vector.shape_cast %11 : vector<1x4x64xbf16> to vector<4x64xbf16>
    %13 = vector.shape_cast %10 : vector<4x64xbf16> to vector<1x4x64xbf16>
    tpu.vector_store %arg6[%c0_9, %c0_10, %c0_11], %13 {strides = array<i32>} : memref<1x4x64xbf16, #tpu.memory_space<vmem>>, vector<1x4x64xbf16>,
    return
  }
  func.func @transform_0(%arg0: i32, %arg1: i32) -> (i32, i32, i32) {
    %c0_i32 = arith.constant 0 : i32
    %c0_i32_0 = arith.constant 0 : i32
    return %arg0, %arg1, %c0_i32 : i32, i32, i32
  }
  func.func @transform_1(%arg0: i32, %arg1: i32) -> (i32, i32) {
    %c0_i32 = arith.constant 0 : i32
    %c0_i32_0 = arith.constant 0 : i32
    %c0_i32_1 = arith.constant 0 : i32
    return %c0_i32, %c0_i32_0 : i32, i32
  }
  func.func @transform_2(%arg0: i32, %arg1: i32) -> (i32, i32) {
    %c0_i32 = arith.constant 0 : i32
    %c0_i32_0 = arith.constant 0 : i32
    %c0_i32_1 = arith.constant 0 : i32
    return %c0_i32, %c0_i32_0 : i32, i32
  }
  func.func @transform_3(%arg0: i32, %arg1: i32) -> (i32, i32, i32) {
    %c0_i32 = arith.constant 0 : i32
    %c0_i32_0 = arith.constant 0 : i32
    return %arg0, %arg1, %c0_i32 : i32, i32, i32
  }
  func.func @transform_4(%arg0: i32, %arg1: i32) -> (i32, i32, i32) {
    %c0_i32 = arith.constant 0 : i32
    %c0_i32_0 = arith.constant 0 : i32
    return %arg0, %arg1, %c0_i32 : i32, i32, i32
  }
}

</mosaic_0001>

<bundles_post_ra>
// kernel: tpu_custom_call.1
= control target key start
LH: loop header
LB: loop body
LE: loop exit
PB: predicated region body
PF: predicated region fallthrough
CT: control target
= control target key end

     0   :  { %9 = vsyncpa [#allocation3], 0  ;;  %s1134_s0 = inlined_call_operand.vmem [shape: bf16[2,4,384], index: 0, kind: input, shape index: {}]   ;;  %s1135_s1 = inlined_call_operand.vmem [shape: bf16[384,64], index: 1, kind: input, shape index: {}]   ;;  %s1136_s2 = inlined_call_operand.vmem [shape: f32[1,64], index: 2, kind: input, shape index: {}]   ;;  %s1137_s3 = inlined_call_operand.vmem [shape: f32[2,4,64], index: 3, kind: input, shape index: {}]   ;;  %s1138_s4 = inlined_call_operand.hbm [shape: bf16[2,4,64], index: 4, kind: output, shape index: {}]  }
   0x1   :  { %11 = vsyncpa [#allocation3 + $0x1], 0  ;;  %s944_s15 = smov 0   ;;  %s946_s16 = smov 0  }
   0x2   :  { %s948_s17 = smov 0   ;;  %s950_s18 = smov 0  }
   0x3   :  { %s952_s19 = smov 0   ;;  %s954_s20 = smov 0  }
   0x4 LB: > { %s665_s21 = sadd.s32 4294967295, %s913_s20   ;;  %s666_s22 = sadd.s32 4294967294, %s913_s20   ;;  %s913_s20 = sphi %s954_s20, %s17_s20   ;;  %s909_s19 = sphi %s952_s19, %s1145_s19   ;;  %s905_s18 = sphi %s950_s18, %s1144_s18   ;;  %s901_s17 = sphi %s948_s17, %s1143_s17   ;;  %s897_s16 = sphi %s946_s16, %s1142_s16   ;;  %s893_s15 = sphi %s944_s15, %s1141_s15  }
   0x5   : > { %s29_s23 = sadd.s32 1, %s909_s19  ;;  %s136_s24 = sadd.s32 1, %s901_s17 }
   0x6   : > { %p31_p0 = scmp.ge.s32.totalorder %s29_s23, 2  ;;  %p146_p1 = scmp.ne.s32.totalorder %s901_s17, %s897_s16 }
   0x7   : > { %p147_p2 = scmp.eq.s32.totalorder %s665_s21, 1  ;;  %p152_p3 = scmp.ne.s32.totalorder %s897_s16, %s893_s15 }
   0x8   : > { %s1147_s23 = smov (%p31_p0, %s29_s23), 0  ;;  %p153_p5 = scmp.eq.s32.totalorder %s666_s22, 1 }
   0x9   : > { %p984_p4 = por %p147_p2, %p146_p1  ;;  %s131_s26 = ssub.s32 %s909_s19, %s1147_s23 }
   0xa   : > { %p669_p6 = scmp.ge.s32.totalorder %s913_s20, 1  ;;  %p134_p7 = scmp.eq.s32.totalorder %s131_s26, 0 }
   0xb   : > { %p991_p8 = por %p153_p5, %p152_p3  ;;  %p199_p9 = scmp.lt.s32.totalorder %s913_s20, 3 }
   0xc   : > { %s997_s28 = scalar_select %p134_p7, %s901_s17, %s136_s24  }
   0xd   : > { %p200_p10 = pnand %p669_p6, %p199_p9 }
   0xe   : > { %p236_p11 = scmp.lt.s32.totalorder (!%p200_p10), %s905_s18, 1  ;;  %s233_s9 = sand.u32 (!%p200_p10), 1, %s897_s16  }
   0xf   : > { %203 = sbr.rel (%p200_p10) target bundleno = 271 (0x10f), region = 36  ;;  %s559_s7 = scalar_lea.sflag (!%p200_p10), [#allocation3], %s233_s9 }
  0x14   : > { %v812_v0 = vld [vmem:[%s1135_s1 + $0x78] sm:$0xff]   ;;  %v915_v1 = vmov 0.0   ;;  %v815_v4 = vld [vmem:[%s1135_s1 + $0x70] sm:$0xff]   ;;  %v818_v7 = vld [vmem:[%s1135_s1 + $0x68] sm:$0xff]   ;;  %vm916_vm0 = vmmov 0   ;;  %s1045_s13 = scalar_select %p236_p11, %s905_s18, 1  ;;  %v314_v20 = vlaneseq }
  0x15   : > { %733 = vmatprep.subr.bf16.mxu1 %v915_v1  ;;  %v813_v2 = vld [vmem:[%s1135_s1 + $0x38] sm:$0xff]   ;;  %702 = vmatprep.subr.bf16.mxu0 %v812_v0  ;;  %v816_v5 = vld [vmem:[%s1135_s1 + $0x30] sm:$0xff]   ;;  %v819_v8 = vld [vmem:[%s1135_s1 + $0x28] sm:$0xff]   ;;  %v917_v25 = vmov 1983009808   ;;  %vm556_vm1 = vcmask 517120  }
  0x16   : > { %v814_v3 = vld [vmem:[%s1135_s1 + $0xb8] sm:$0xff]   ;;  %703 = vmatpush3.bf16.msra.mxu0 %v813_v2  ;;  %v817_v6 = vld [vmem:[%s1135_s1 + $0xb0] sm:$0xff]   ;;  %749 = vmatprep.mubr.msk.bf16.mxu1 %vm916_vm0, %v915_v1  ;;  %v820_v9 = vld [vmem:[%s1135_s1 + $0xa8] sm:$0xff]   ;;  %s753_s30 = smul.u32 6, %s1045_s13  ;;  %v312_v26 = vunpack.c.l.s4 %v917_v25  ;;  %v315_v27 = vshrl.u32 %v314_v20, 7  ;;  %s672_s10 = sshll.u32 %s1045_s13, 2 }
  0x17   : > { %734 = vmatpush3.bf16.msra.mxu1 %v814_v3  ;;  %704 = vmatprep.subr.bf16.mxu0 %v815_v4  ;;  %v821_v10 = vld [vmem:[%s1135_s1 + $0x60] sm:$0xff]   ;;  %v824_v13 = vld [vmem:[%s1135_s1 + $0x58] sm:$0xff]   ;;  %v827_v16 = vld [vmem:[%s1135_s1 + $0x50] sm:$0xff]   ;;  %s251_s24 = scalar_lea.vmem %s1137_s3, %s672_s10  ;;  %s699_s13 = sshll.u32 %s905_s18, 5 }
  0x18   : > { %735 = vmatprep.subr.bf16.mxu1 %v915_v1  ;;  %v822_v11 = vld [vmem:[%s1135_s1 + $0x20] sm:$0xff]   ;;  %v825_v14 = vld [vmem:[%s1135_s1 + $0x18] sm:$0xff]   ;;  %v828_v17 = vld [vmem:[%s1135_s1 + $0x10] sm:$0xff]   ;;  %s244_s14 = scalar_lea.vmem %s1134_s0, %s753_s30  ;;  %v313_v30 = vunpack.c.0.s8 %v312_v26  ;;  %s571_s6 = scalar_lea.hbm %s1138_s4, %s699_s13 }
  0x19   : > { %v823_v12 = vld [vmem:[%s1135_s1 + $0xa0] sm:$0xff]   ;;  %v826_v15 = vld [vmem:[%s1135_s1 + $0x98] sm:$0xff]   ;;  %v829_v18 = vld [vmem:[%s1135_s1 + $0x90] sm:$0xff]   ;;  %s918_s10 = smov [#allocation2]  }
  0x1a   : > { %705 = vmatpush3.bf16.msra.mxu0 %v816_v5  ;;  %v830_v19 = vld [vmem:[%s1135_s1 + $0x48] sm:$0xff]   ;;  %v833_v23 = vld [vmem:[%s1135_s1 + $0x40] sm:$0xff]   ;;  %v316_v32 = vsub.s32 %v313_v30, %v315_v27  ;;  %s841_s11 = sshll.u32 %s918_s10, 4  ;;  %s842_s11 = int_to_ptr.vmem [resolvable:$false] %s841_s11 }
  0x1b   : > { %736 = vmatpush3.bf16.msra.mxu1 %v817_v6  ;;  %706 = vmatprep.subr.bf16.mxu0 %v818_v7  ;;  %v831_v21 = vld [vmem:[%s1135_s1 + $0x8] sm:$0xff]   ;;  %v253_v24 = vld [vmem:[%s244_s14] sm:$0x3f]  ;;  %s670_s14 = sshll.u32 %s233_s9, 1  ;;  %s843_s18 = scalar_lea.vmem %s842_s11, 64 }
  0x1c   : > { %737 = vmatprep.subr.bf16.mxu1 %v915_v1  ;;  %v832_v22 = vld [vmem:[%s1135_s1 + $0x88] sm:$0xff]   ;;  %v834_v28 = vld [vmem:[%s1135_s1] sm:$0xff]   ;;  %v310_v29 = vcombine.high %v253_v24, %v253_v24  ;;  %v317_v33 = vrot.slane %v253_v24, %v316_v32  ;;  %s235_s26 = scalar_lea.vmem [#allocation2], %s670_s14 }
  0x1d   : > { %v835_v31 = vld [vmem:[%s1135_s1 + $0x80] sm:$0xff]   ;;  %s573_s29 = sshll.u32 %s235_s26, 4  ;;  %s574_s29 = int_to_ptr.vmem [resolvable:$true] %s573_s29 }
  0x1e   : > { %707 = vmatpush3.bf16.msra.mxu0 %v819_v8  ;;  %v324_v34 = vrot.slane %v310_v29, %v316_v32  ;;  %v325_v35 = vcombine.high %v317_v33, %v317_v33  ;;  %v673_v39 = vld [vmem:[%s1136_s2] ss:$0 sm:$0xff]  ;;  %s837_s8 = scalar_lea.vmem %s574_s29, 32  ;;  %p844_p1 = scmp.lt.s32.totalorder %s574_s29, %s842_s11 }
  0x1f   : > { %738 = vmatpush3.bf16.msra.mxu1 %v820_v9  ;;  %708 = vmatprep.subr.bf16.mxu0 %v821_v10  ;;  %v553_v46 = vld [vmem:[%s251_s24] sm:$0xf]  ;;  %p838_p12 = scmp.ne.s32.totalorder %s574_s29, %s837_s8  ;;  %p845_p2 = scmp.lt.s32.totalorder %s843_s18, %s837_s8 }
  0x20   : > { %739 = vmatprep.subr.bf16.mxu1 %v915_v1  ;;  %505 = vmatprep.mubr.bf16.mxu0 %v325_v35 }
  0x21   : > { %p839_p13 = pnand %p838_p12, %p984_p4  ;;  %p846_p3 = por %p845_p2, %p844_p1 }
  0x22   : > { %709 = vmatpush3.bf16.msra.mxu0 %v822_v11 }
  0x23   : > { %740 = vmatpush3.bf16.msra.mxu1 %v823_v12  ;;  %710 = vmatprep.subr.bf16.mxu0 %v824_v13  ;;  %p840_p0 = pneg %p839_p13 }
  0x24   : > { %741 = vmatprep.subr.bf16.mxu1 %v915_v1 }
  0x25   : > { %p847_p5 = pnand %p846_p3, %p840_p0 }
  0x26   : > { %711 = vmatpush3.bf16.msra.mxu0 %v825_v14 }
  0x27   : > { %742 = vmatpush3.bf16.msra.mxu1 %v826_v15  ;;  %712 = vmatprep.subr.bf16.mxu0 %v827_v16 }
  0x28   : > { %743 = vmatprep.subr.bf16.mxu1 %v915_v1 }
  0x2a   : > { %713 = vmatpush3.bf16.msra.mxu0 %v828_v17 }
  0x2b   : > { %744 = vmatpush3.bf16.msra.mxu1 %v829_v18  ;;  %714 = vmatprep.subr.bf16.mxu0 %v830_v19 }
  0x2c   : > { %745 = vmatprep.subr.bf16.mxu1 %v915_v1 }
  0x2e   : > { %715 = vmatpush3.bf16.msra.mxu0 %v831_v21 }
  0x2f   : > { %746 = vmatpush3.bf16.msra.mxu1 %v832_v22  ;;  %716 = vmatprep.subr.bf16.mxu0 %v833_v23 }
  0x30   : > { %747 = vmatprep.subr.bf16.mxu1 %v915_v1 }
  0x32   : > { %717 = vmatpush3.bf16.msra.mxu0 %v834_v28 }
  0x33   : > { %748 = vmatpush3.bf16.msra.mxu1 %v835_v31 }
  0x35   : > { %506 = vmatmul.mubr.bf16.vlgmr.msra.gmra.mxu0 %v317_v33 }
  0x36   : > { %750 = vmatmul.mubr.bf16.vlgmr.msra.gmra.mxu1 %v324_v34 }
  0xf5   : > { %v718_v37 = vpop.f32.mrf.mxu0 }
  0xf6   : > { %v547_v36 = vpop.f32.mrf.mxu1 }
  0xf7   : > { %v719_v40 = vpop.f32.mrf.mxu0 }
  0xf8   : > { %v751_v38 = vpop.f32.mrf.mxu1  ;;  %v720_v41 = vadd.f32 %v719_v40, %v718_v37 }
  0xf9   : > { %v721_v43 = vpop.f32.mrf.mxu0 }
  0xfa   : > { %v550_v42 = vpop.f32.mrf.mxu1  ;;  %v508_v44 = vadd.f32 %v720_v41, %v673_v39 }
  0xfb   : > { %v722_v47 = vpop.f32.mrf.mxu0 }
  0xfc   : > { %v752_v45 = vpop.f32.mrf.mxu1  ;;  %v548_v48 = vadd.f32 %v547_v36, %v508_v44 }
  0xfe   : > { %v554_v49 = vadd.f32 %v553_v46, %v548_v48 }
 0x100   : > { %v555_v50 = vpack.c.bf16 %v554_v49, %v554_v49 }
 0x102   : > { %557 = vst.msk [vmem:[%s235_s26] sm:$0x3] %vm556_vm1, %v555_v50 }
 0x103   : > { %850 = shalt.err (!%p847_p5)
}
 0x104   : > { %s851_s12 = scalar_lea.hbm %s571_s6, 32  ;;  %s855_s21 = scalar_lea.hbm %s1138_s4, 64 }
 0x105   : > { %p852_p6 = scmp.ne.s32.totalorder %s571_s6, %s851_s12  ;;  %p856_p10 = scmp.lt.s32.totalorder %s571_s6, %s1138_s4 }
 0x106   : > { %p857_p11 = scmp.lt.s32.totalorder %s855_s21, %s851_s12 }
 0x107   : > { %p853_p7 = pnand %p852_p6, %p984_p4 }
 0x108   : > { %p858_p12 = por %p857_p11, %p856_p10 }
 0x109   : > { %p854_p9 = pneg %p853_p7 }
 0x10b   : > { %p859_p13 = pnand %p858_p12, %p854_p9 }
 0x10d   : > { %862 = shalt.err (!%p859_p13)
}
 0x10e   : > { %754 = dma.vmem_to_hbm [thread:$0]  (%p984_p4), %s574_s29, 32, %s571_s6, %s559_s7  }
 0x10f PF: > { %p760_p0 = scmp.ge.s32.totalorder %s913_s20, 2  ;;  %s585_s13 = sand.u32 1, %s893_s15  }
 0x110   : > { %s586_s26 = scalar_lea.sflag [#allocation3], %s585_s13 }
 0x111   : > { %p757_p1 = pnand %p760_p0, %p991_p8 }
 0x113   : > { %p758_p2 = pneg %p757_p1 }
 0x115   : > { %888 = dma.done.wait (%p758_p2), %s586_s26, 32  }
 0x116   : > { %890 = vsyncadd (%p758_p2), %s586_s26, 4294967264  ;;  %s17_s20 = sadd.s32 1, %s913_s20   ;;  %s1141_s15 = smov %s897_s16 }
 0x117   : > { %p14_p3 = scmp.ge.s32.totalorder %s17_s20, 4   ;;  %s1142_s16 = smov %s901_s17 }
 0x118   : > { %s1143_s17 = smov %s997_s28  ;;  %s1144_s18 = smov %s909_s19 }
 0x119   : > { %s1145_s19 = smov %s1147_s23  ;;  %16 = sbr.rel (!%p14_p3) target bundleno = 4 (0x4), region = 74 }
 0x11e   :  { %591 = vsyncpa [#allocation3], 1 }
 0x11f   :  { %593 = vsyncpa [#allocation3 + $0x1], 1 }

</bundles_post_ra>
